<compile_context>
chip_gen: v7x
topology: tpu7x:2x2x1
jax: 0.10.0
libtpu: 0.0.40
codegen_flags: <defaults>
</compile_context>

<pallas_src>
import numpy as np

import jax
import jax.numpy as jnp
from jax.experimental import pallas as pl
from jax.experimental.pallas import tpu as pltpu


def last_conv_block(x, weight, bias, *, tile_n=None):
    """StyleGAN LastConvBlock forward.

    x:      (B, C, H, W)   feature map
    weight: (O, C)         1x1 conv weight (PyTorch (O, C, 1, 1) squeezed)
    bias:   (O,)           output bias
    returns (B, O, H, W)
    """
    B, C, H, W = x.shape
    O = weight.shape[0]
    assert weight.shape == (O, C)
    assert bias.shape == (O,)

    HW = H * W
    scale = float(1.0 / np.sqrt(C))

    # Lane-dense layout: last axis = H*W (lanes), channels on sublanes.
    x2 = x.reshape(B, C, HW)
    b2 = bias.reshape(O, 1)  # VMEM column, broadcasts along lanes

    if tile_n is None:
        # Largest lane-dense spatial tile that divides H*W and keeps the
        # double-buffered x/out tiles comfortably inside the scoped VMEM
        # budget (re-derive max_tile for v7x's smaller VMEM at huge C*HW).
        tile_n = HW
        max_tile = 32768
        if HW % 128 == 0:
            while tile_n > max_tile and tile_n % 2 == 0:
                tile_n //= 2
    assert HW % tile_n == 0
    grid = (B, HW // tile_n)

    def kernel(w_ref, b_ref, x_ref, o_ref):
        # w_ref: (O, C); b_ref: (O, 1); x_ref/o_ref: (1, C, tile_n)/(1, O, tile_n)
        xt = x_ref[0]                                   # (C, tile_n)
        y = jnp.dot(w_ref[...], xt,
                    preferred_element_type=jnp.float32)  # MXU: (O, tile_n)
        o_ref[0] = (y * scale + b_ref[...]).astype(o_ref.dtype)

    out = pl.pallas_call(
        kernel,
        out_shape=jax.ShapeDtypeStruct((B, O, HW), x.dtype),
        grid_spec=pltpu.PrefetchScalarGridSpec(
            num_scalar_prefetch=0,
            grid=grid,
            in_specs=[
                # conv weight: resident across the whole grid
                pl.BlockSpec((O, C), lambda b, n: (0, 0)),
                # bias column: resident across the whole grid
                pl.BlockSpec((O, 1), lambda b, n: (0, 0)),
                # x tile: one batch element, all channels, lane-dense spatial tile
                pl.BlockSpec((1, C, tile_n), lambda b, n: (b, 0, n)),
            ],
            out_specs=pl.BlockSpec((1, O, tile_n), lambda b, n: (b, 0, n)),
        ),
        compiler_params=pltpu.CompilerParams(
            dimension_semantics=("parallel", "parallel")),
    )(weight, b2, x2)

    return out.reshape(B, O, H, W)


if __name__ == "__main__":
    # Small config consistent with the module: batch=2, channels=4, 16x16 map.
    B, C, H, W = 2, 4, 16, 16
    O = 3  # RGB

    key = jax.random.PRNGKey(0)
    kx, kw, kb = jax.random.split(key, 3)

    x = jax.random.normal(kx, (B, C, H, W), dtype=jnp.float32)
    # PyTorch Conv2d weight (O, C, 1, 1) squeezed to (O, C).
    weight = jax.random.normal(kw, (O, C), dtype=jnp.float32)
    # PyTorch init is zeros(3); use non-zero values so the bias path is exercised.
    bias = jax.random.normal(kb, (O,), dtype=jnp.float32) * 0.1

    out = last_conv_block(x, weight, bias)
    out = jax.block_until_ready(out)

    # Pure-JAX reference of the PyTorch forward.
    scale = 1.0 / np.sqrt(C)
    ref = (jnp.einsum("oc,bchw->bohw", weight, x,
                      precision=jax.lax.Precision.HIGHEST) * scale
           + bias.reshape(1, O, 1, 1))

    assert out.shape == (B, O, H, W)
    assert jnp.allclose(out, ref, atol=1e-5, rtol=1e-5)

    print("KERNEL_OK")
</pallas_src>

<mosaic_0001>
module attributes {stable_mosaic.version = 11 : i64} {
  func.func @kernel(%arg0: i32, %arg1: i32, %arg2: memref<3x4xf32, #tpu.memory_space<vmem>>, %arg3: memref<3x1xf32, #tpu.memory_space<vmem>>, %arg4: memref<1x4x256xf32, #tpu.memory_space<vmem>>, %arg5: memref<1x3x256xf32, #tpu.memory_space<vmem>>) attributes {dimension_semantics = [#tpu.dimension_semantics<parallel>, #tpu.dimension_semantics<parallel>], iteration_bounds = array<i64: 2, 1>, scalar_prefetch = 0 : i64, scratch_operands = 0 : i64, tpu.core_type = #tpu.core_type<tc>, window_params = [{pipeline_mode = #tpu.pipeline_mode<synchronous>, transform_indices = @transform_0, window_bounds = array<i64: 3, 4>}, {pipeline_mode = #tpu.pipeline_mode<synchronous>, transform_indices = @transform_1, window_bounds = array<i64: 3, 1>}, {transform_indices = @transform_2, window_bounds = array<i64: 1, 4, 256>}, {transform_indices = @transform_3, window_bounds = array<i64: 1, 3, 256>}]} {
    %c0 = arith.constant 0 : index
    %c0_0 = arith.constant 0 : index
    %c0_1 = arith.constant 0 : index
    %0 = vector.load %arg4[%c0, %c0_0, %c0_1] : memref<1x4x256xf32, #tpu.memory_space<vmem>>, vector<1x4x256xf32>
    %1 = vector.shape_cast %0 : vector<1x4x256xf32> to vector<4x256xf32>
    %c0_2 = arith.constant 0 : index
    %c0_3 = arith.constant 0 : index
    %2 = vector.load %arg2[%c0_2, %c0_3] : memref<3x4xf32, #tpu.memory_space<vmem>>, vector<3x4xf32>
    %cst = arith.constant dense<0.000000e+00> : vector<3x256xf32>
    %3 = tpu.matmul %2, %1, %cst {dimension_numbers = #tpu.dot_dimension_numbers<[1], [0], [0], [1], [0, 0, 1, 1], [], []>} : vector<3x4xf32>, vector<4x256xf32>, vector<3x256xf32> -> vector<3x256xf32>
    %cst_4 = arith.constant 5.000000e-01 : f32
    %4 = vector.broadcast %cst_4 : f32 to vector<3x256xf32>
    %5 = arith.mulf %3, %4 : vector<3x256xf32>
    %c0_5 = arith.constant 0 : index
    %c0_6 = arith.constant 0 : index
    %6 = vector.load %arg3[%c0_5, %c0_6] : memref<3x1xf32, #tpu.memory_space<vmem>>, vector<3x1xf32>
    %7 = vector.broadcast %6 : vector<3x1xf32> to vector<3x256xf32>
    %8 = arith.addf %5, %7 : vector<3x256xf32>
    %c0_7 = arith.constant 0 : index
    %c0_8 = arith.constant 0 : index
    %c0_9 = arith.constant 0 : index
    %9 = vector.load %arg5[%c0_7, %c0_8, %c0_9] : memref<1x3x256xf32, #tpu.memory_space<vmem>>, vector<1x3x256xf32>
    %10 = vector.shape_cast %9 : vector<1x3x256xf32> to vector<3x256xf32>
    %11 = vector.shape_cast %8 : vector<3x256xf32> to vector<1x3x256xf32>
    tpu.vector_store %arg5[%c0_7, %c0_8, %c0_9], %11 {strides = array<i32>} : memref<1x3x256xf32, #tpu.memory_space<vmem>>, vector<1x3x256xf32>,
    return
  }
  func.func @transform_0(%arg0: i32, %arg1: i32) -> (i32, i32) {
    %c0_i32 = arith.constant 0 : i32
    %c0_i32_0 = arith.constant 0 : i32
    %c0_i32_1 = arith.constant 0 : i32
    return %c0_i32, %c0_i32_0 : i32, i32
  }
  func.func @transform_1(%arg0: i32, %arg1: i32) -> (i32, i32) {
    %c0_i32 = arith.constant 0 : i32
    %c0_i32_0 = arith.constant 0 : i32
    %c0_i32_1 = arith.constant 0 : i32
    return %c0_i32, %c0_i32_0 : i32, i32
  }
  func.func @transform_2(%arg0: i32, %arg1: i32) -> (i32, i32, i32) {
    %c0_i32 = arith.constant 0 : i32
    %c0_i32_0 = arith.constant 0 : i32
    return %arg0, %c0_i32, %arg1 : i32, i32, i32
  }
  func.func @transform_3(%arg0: i32, %arg1: i32) -> (i32, i32, i32) {
    %c0_i32 = arith.constant 0 : i32
    %c0_i32_0 = arith.constant 0 : i32
    return %arg0, %c0_i32, %arg1 : i32, i32, i32
  }
}

</mosaic_0001>

<bundles_post_ra>
// kernel: tpu_custom_call.1
= control target key start
LH: loop header
LB: loop body
LE: loop exit
PB: predicated region body
PF: predicated region fallthrough
CT: control target
= control target key end

     0   :  { %8 = vsyncpa [#allocation3], 0  ;;  %s724_s0 = inlined_call_operand.vmem [shape: f32[3,4], index: 0, kind: input, shape index: {}]   ;;  %s725_s1 = inlined_call_operand.vmem [shape: f32[3,1], index: 1, kind: input, shape index: {}]   ;;  %s726_s2 = inlined_call_operand.hbm [shape: f32[2,4,256], index: 2, kind: input, shape index: {}]   ;;  %s727_s3 = inlined_call_operand.vmem [shape: f32[2,3,256], index: 3, kind: output, shape index: {}]  }
   0x1   :  { %10 = vsyncpa [#allocation3 + $0x1], 0  ;;  %s593_s12 = smov 0   ;;  %s595_s13 = smov 0  }
   0x2   :  { %s597_s14 = smov 0   ;;  %s599_s15 = smov 0  }
   0x3   :  { %s601_s16 = smov 0   ;;  %s603_s17 = smov 0  }
   0x4 LB: > { %s411_s18 = sadd.s32 4294967295, %s568_s17   ;;  %s28_s19 = sadd.s32 1, %s564_s16  ;;  %s568_s17 = sphi %s603_s17, %s16_s17   ;;  %s564_s16 = sphi %s601_s16, %s737_s16   ;;  %s560_s15 = sphi %s599_s15, %s736_s15   ;;  %s556_s14 = sphi %s597_s14, %s735_s14   ;;  %s552_s13 = sphi %s595_s13, %s734_s13   ;;  %s548_s12 = sphi %s593_s12, %s733_s12  }
   0x5   : > { %p30_p0 = scmp.ge.s32.totalorder %s28_s19, 2  ;;  %s79_s20 = sadd.s32 1, %s556_s14 }
   0x6   : > { %p86_p1 = scmp.ne.s32.totalorder %s556_s14, %s552_s13  ;;  %p87_p2 = scmp.eq.s32.totalorder %s568_s17, 0 }
   0x7   : > { %s739_s19 = smov (%p30_p0, %s28_s19), 0  ;;  %p92_p4 = scmp.ne.s32.totalorder %s552_s13, %s548_s12 }
   0x8   : > { %p629_p3 = por %p87_p2, %p86_p1  ;;  %s74_s22 = ssub.s32 %s564_s16, %s739_s19 }
   0x9   : > { %p93_p5 = scmp.eq.s32.totalorder %s411_s18, 0  ;;  %p77_p6 = scmp.eq.s32.totalorder %s74_s22, 0 }
   0xa   : > { %p435_p8 = scmp.lt.s32.totalorder %s568_s17, 2  ;;  %s150_s25 = sand.u32 1, %s556_s14  }
   0xb   : > { %p636_p7 = por %p93_p5, %p92_p4  ;;  %s427_s26 = sshll.u32 %s564_s16, 7 }
   0xc   : > { %s642_s24 = scalar_select %p77_p6, %s556_s14, %s79_s20  }
   0xd   : > { %s415_s27 = sshll.u32 %s150_s25, 3  ;;  %s649_s30 = scalar_lea.hbm %s726_s2, %s427_s26 }
   0xe   : > { %s154_s4 = scalar_lea.vmem [#allocation2], %s415_s27  ;;  %p653_p9 = pnand %p435_p8, %p629_p3 }
   0xf   : > { %s164_s5 = sshll.u32 %s154_s4, 4  ;;  %s151_s7 = scalar_lea.sflag [#allocation3], %s150_s25  ;;  %s657_s5 = int_to_ptr.vmem [resolvable:$true] %s164_s5 }
  0x10   : > { %s488_s8 = scalar_lea.hbm %s649_s30, 128  ;;  %p490_p13 = pneg %p653_p9 }
  0x11   : > { %p489_p12 = scmp.ne.s32.totalorder %s649_s30, %s488_s8  ;;  %s493_s11 = scalar_lea.hbm %s726_s2, 256 }
  0x12   : > { %p494_p2 = scmp.lt.u32.totalorder %s649_s30, %s726_s2  ;;  %p495_p3 = scmp.lt.u32.totalorder %s493_s11, %s488_s8 }
  0x13   : > { %p491_p0 = pnand %p490_p13, %p489_p12  ;;  %p497_p5 = scmp.lt.u32.totalorder %s488_s8, %s649_s30 }
  0x14   : > { %p496_p4 = por %p495_p3, %p494_p2 }
  0x15   : > { %p492_p1 = pneg %p491_p0 }
  0x16   : > { %p498_p6 = por %p497_p5, %p496_p4 }
  0x18   : > { %p499_p8 = pnand %p498_p6, %p492_p1 }
  0x1a   : > { %502 = shalt.err (!%p499_p8)
}
  0x1b   : > { %s503_s20 = scalar_lea.vmem %s657_s5, 128  ;;  %s570_s21 = smov [#allocation2]  }
  0x1c   : > { %p504_p12 = scmp.ne.s32.totalorder %s657_s5, %s503_s20  ;;  %s508_s22 = sshll.u32 %s570_s21, 4  ;;  %s509_s22 = int_to_ptr.vmem [resolvable:$false] %s508_s22 }
  0x1d   : > { %s510_s25 = scalar_lea.vmem %s509_s22, 256  ;;  %p511_p11 = scmp.lt.s32.totalorder %s657_s5, %s509_s22 }
  0x1e   : > { %p506_p0 = pnand %p504_p12, %p490_p13  ;;  %p512_p2 = scmp.lt.s32.totalorder %s510_s25, %s503_s20 }
  0x20   : > { %p507_p10 = pneg %p506_p0  ;;  %p513_p3 = por %p512_p2, %p511_p11 }
  0x22   : > { %p514_p4 = pnand %p513_p3, %p507_p10 }
  0x24   : > { %517 = shalt.err (!%p514_p4)
}
  0x25   : > { %434 = dma.hbm_to_vmem [thread:$0]  (!%p653_p9), %s649_s30, 128, %s657_s5, %s151_s7  }
  0x26   : > { %p731_p1 = scmp.lt.s32.totalorder %s568_s17, 3  ;;  %p732_p5 = scmp.ge.s32.totalorder %s568_s17, 1 }
  0x28   : > { %p170_p13 = pnand %p732_p5, %p731_p1 }
  0x29   : > { %s175_s26 = sand.u32 (!%p170_p13), 1, %s552_s13  }
  0x2a   : > { %173 = sbr.rel (%p170_p13) target bundleno = 275 (0x113), region = 32  ;;  %s419_s27 = sshll.u32 (!%p170_p13), %s175_s26, 3 }
  0x2b   : > { %s176_s28 = scalar_lea.sflag (!%p170_p13), [#allocation3], %s175_s26  ;;  %s179_s29 = scalar_lea.vmem (!%p170_p13), [#allocation2], %s419_s27 }
  0x31   : > { %543 = dma.done.wait (%p636_p7), %s176_s28, 128  }
  0x32   : > { %545 = vsyncadd (%p636_p7), %s176_s28, 4294967168  ;;  %v571_v0 = vmov 0.0   ;;  %v572_v1 = vmov 0   ;;  %v217_v2 = vld [vmem:[%s179_s29] sm:$0xff]  ;;  %vm225_vm0 = vcmask 1043456   ;;  %vm221_vm1 = vcmask 31744  }
  0x33   : > { %294 = vmatprep.mubr.f32.mxu0 %v571_v0  ;;  %486 = vset.pattern.permute.xlu0 %v572_v1  ;;  %v303_v3 = vld [vmem:[%s725_s1] sm:$0x7]  ;;  %v220_v4 = vcombine.high %v217_v2, %v217_v2  ;;  %p208_p7 = scmp.lt.s32.totalorder %s560_s15, 1 }
  0x34   : > { %306 = vperm.xlu0 %486, %v303_v3   ;;  %v218_v5 = vld [vmem:[%s724_s0] sm:$0x7] }
  0x35   : > { %422 = vmatprep.subr.msk.mxu0 %vm225_vm0, %v220_v4  ;;  %s741_s15 = smov (!%p208_p7, %s560_s15), 1 }
  0x36   : > { %423 = vmatpush1.msk.msra.mxu0 %vm225_vm0, %v217_v2  ;;  %s428_s23 = sshll.u32 %s741_s15, 3 }
  0x37   : > { %424 = vmatmul.mubr.msk.f32.vlgmr.msra.gmra.mrb[0].mxu0 %vm221_vm1, %v218_v5  ;;  %s215_s9 = scalar_lea.vmem %s727_s3, %s428_s23 }
  0xb3   : > { %v307_v7 = vpop.permute.xlu0 %306 }
 0x10a   : > { %v296_v6 = vpop.f32.mrb[0].mxu0 }
 0x10b   : > { %v301_v8 = vmul.f32 0.5, %v296_v6  ;;  %v298_v9 = vpop.f32.mrb[1].mxu0 }
 0x10c   : > { %v302_v10 = vmul.f32 0.5, %v298_v9 }
 0x10d   : > { %v309_v11 = vadd.f32 %v307_v7, %v301_v8 }
 0x10e   : > { %v310_v12 = vadd.f32 %v307_v7, %v302_v10 }
 0x110   : > { %v313_v13 = vcombine.low %v309_v11, %v310_v12 }
 0x112   : > { %315 = vst [vmem:[%s215_s9] sm:$0x77] %v313_v13 }
 0x113 PF: > { %s16_s17 = sadd.s32 1, %s568_s17   ;;  %s733_s12 = smov %s552_s13 }
 0x114   : > { %p13_p9 = scmp.ge.s32.totalorder %s16_s17, 4   ;;  %s734_s13 = smov %s556_s14 }
 0x115   : > { %s735_s14 = smov %s642_s24  ;;  %s736_s15 = smov %s564_s16 }
 0x116   : > { %s737_s16 = smov %s739_s19  ;;  %15 = sbr.rel (!%p13_p9) target bundleno = 4 (0x4), region = 72 }
 0x11d   :  { %346 = vsyncpa [#allocation3], 1 }
 0x11e   :  { %348 = vsyncpa [#allocation3 + $0x1], 1 }

</bundles_post_ra>
